<compile_context>
chip_gen: v7x
topology: tpu7x:2x2x1
jax: 0.10.0
libtpu: 0.0.40
codegen_flags: <defaults>
</compile_context>

<pallas_src>
import functools

import jax
import jax.numpy as jnp
from jax.experimental import pallas as pl
from jax.experimental.pallas import tpu as pltpu

EPS = 1e-5


def _conv1x1_bn_kernel(w_ref, x_ref, gb_ref, o_ref):
    # w_ref:  [Cb, Cin]  bf16   (Cb = Cout / num_blocks)
    # x_ref:  [Cin, M]   bf16   (M = N*H*W pixels)
    # gb_ref: [Cb, 2]    f32    (col 0 = gamma, col 1 = beta)
    # o_ref:  [Cb, M]    f32
    y = jnp.dot(w_ref[...], x_ref[...], preferred_element_type=jnp.float32)

    # BatchNorm2d (training mode): per-channel batch stats over all pixels,
    # biased variance.  Single-pass: var = E[y^2] - mean^2.  y is O(1) with
    # only ~49 samples/channel, so the cancellation error is negligible in f32.
    m = y.shape[1]
    inv_m = 1.0 / m
    mean = jnp.sum(y, axis=1, keepdims=True) * inv_m              # [Cb, 1]
    mean_sq = jnp.sum(y * y, axis=1, keepdims=True) * inv_m       # [Cb, 1]
    var = mean_sq - mean * mean
    inv_std = jax.lax.rsqrt(var + EPS)                            # EUP rsqrt

    gamma = gb_ref[:, 0:1]
    beta = gb_ref[:, 1:2]
    scale = gamma * inv_std                                       # [Cb, 1]
    shift = beta - mean * scale                                   # [Cb, 1]
    o_ref[...] = (y * scale + shift).astype(o_ref.dtype)


def prepare_params(weight, gamma, beta):
    """One-time parameter prep (parameter-load time, OUTSIDE the jitted fwd).

    Persists the conv weight in bf16 in HBM and packs gamma/beta into a single
    [Cout, 2] f32 array.
    """
    cout, cin = weight.shape[0], weight.shape[1]
    w2d = jnp.asarray(weight).reshape(cout, cin).astype(jnp.bfloat16)
    gb = jnp.stack(
        [jnp.asarray(gamma), jnp.asarray(beta)], axis=1
    ).astype(jnp.float32)
    return w2d, gb


def _num_cout_blocks():
    """Split Cout across TensorCores only on chips with 2 TCs per chip (v7x)."""
    try:
        kind = jax.devices()[0].device_kind.lower()
    except Exception:
        return 1
    return 2 if "v7" in kind else 1


@functools.partial(jax.jit, static_argnames=("num_blocks",))
def conv1x1_bn(x_nchw, w2d, gb, *, num_blocks=1):
    """x_nchw: [N, Cin, H, W]; w2d: [Cout, Cin] bf16; gb: [Cout, 2] f32."""
    n, cin, h, w = x_nchw.shape
    cout = w2d.shape[0]
    m = n * h * w

    if num_blocks < 1 or cout % (8 * num_blocks) != 0:
        num_blocks = 1
    cb = cout // num_blocks

    # NCHW -> [Cin, M]; a free reshape when N == 1 (the module's case).
    if n == 1:
        x2d = x_nchw.reshape(cin, m)
    else:
        # TODO(synk): N>1 path inserts a real transpose HLO; untested by the
        # module spec (N=1).
        x2d = jnp.transpose(x_nchw, (1, 0, 2, 3)).reshape(cin, m)
    # bf16 activations halve X HBM traffic when upstream emits bf16; for f32
    # input the convert is fused into operand production (allow_input_fusion).
    x2d = x2d.astype(jnp.bfloat16)

    out2d = pl.pallas_call(
        _conv1x1_bn_kernel,
        out_shape=jax.ShapeDtypeStruct((cout, m), jnp.float32),
        grid_spec=pltpu.PrefetchScalarGridSpec(
            num_scalar_prefetch=0,
            grid=(num_blocks,),
            in_specs=[
                pl.BlockSpec((cb, cin), lambda i: (i, 0)),
                pl.BlockSpec((cin, m), lambda i: (0, 0)),
                pl.BlockSpec((cb, 2), lambda i: (i, 0)),
            ],
            out_specs=pl.BlockSpec((cb, m), lambda i: (i, 0)),
        ),
        compiler_params=pltpu.CompilerParams(
            dimension_semantics=("parallel",),
            allow_input_fusion=[True, True, True],
        ),
    )(w2d, x2d, gb)

    # [Cout, M] -> NCHW [N, Cout, H, W]; free reshape when N == 1.
    if n == 1:
        return out2d.reshape(1, cout, h, w)
    return jnp.transpose(out2d.reshape(cout, n, h, w), (1, 0, 2, 3))


# TODO(synk): PyTorch BatchNorm2d (training) also updates running_mean /
# running_var with momentum=0.1; this fused forward only normalizes with batch
# stats and does not emit running-stat state.


def reference(x_nchw, weight, gamma, beta):
    """Pure-JAX reference (same bf16 input quantization, f32 math)."""
    n, cin, h, w = x_nchw.shape
    cout = weight.shape[0]
    x2d = jnp.transpose(x_nchw, (0, 2, 3, 1)).reshape(-1, cin).astype(jnp.bfloat16)
    w2d = weight.reshape(cout, cin).T.astype(jnp.bfloat16)
    y = jnp.dot(x2d, w2d, preferred_element_type=jnp.float32)     # [M, Cout]
    mean = jnp.mean(y, axis=0, keepdims=True)
    var = jnp.var(y, axis=0, keepdims=True)                       # biased
    y = (y - mean) * jax.lax.rsqrt(var + EPS) * gamma[None, :] + beta[None, :]
    return jnp.transpose(y.reshape(n, h, w, cout), (0, 3, 1, 2))


if __name__ == "__main__":
    key = jax.random.PRNGKey(0)
    k_x, k_w, k_g, k_b = jax.random.split(key, 4)

    N, CIN, H, W = 1, 800, 7, 7
    COUT = 128

    x = jax.random.normal(k_x, (N, CIN, H, W), dtype=jnp.float32)
    # Deterministic synthetic parameters (Conv2d has no bias; BN affine=True).
    weight = jax.random.normal(k_w, (COUT, CIN, 1, 1), dtype=jnp.float32) * 0.02
    gamma = 1.0 + 0.1 * jax.random.normal(k_g, (COUT,), dtype=jnp.float32)
    beta = 0.1 * jax.random.normal(k_b, (COUT,), dtype=jnp.float32)

    # Parameter-load-time prep (bf16 weight persisted in HBM, packed gamma/beta).
    w2d, gb = prepare_params(weight, gamma, beta)
    num_blocks = _num_cout_blocks()

    out = conv1x1_bn(x, w2d, gb, num_blocks=num_blocks)
    out = jax.block_until_ready(out)

    ref = reference(x, weight, gamma, beta)
    assert out.shape == (N, COUT, H, W), out.shape
    max_err = float(jnp.max(jnp.abs(out - ref)))
    assert jnp.allclose(out, ref, atol=2e-3, rtol=2e-3), max_err

    print("KERNEL_OK")
</pallas_src>

<mosaic_0001>
module attributes {stable_mosaic.version = 11 : i64} {
  func.func @_conv1x1_bn_kernel(%arg0: i32, %arg1: memref<128x800xbf16, #tpu.memory_space<vmem>>, %arg2: memref<800x49xbf16, #tpu.memory_space<vmem>>, %arg3: memref<128x2xf32, #tpu.memory_space<vmem>>, %arg4: memref<128x49xf32, #tpu.memory_space<vmem>>) attributes {dimension_semantics = [#tpu.dimension_semantics<parallel>], iteration_bounds = array<i64: 1>, scalar_prefetch = 0 : i64, scratch_operands = 0 : i64, tpu.core_type = #tpu.core_type<tc>, window_params = [{transform_indices = @transform_0, window_bounds = array<i64: 128, 800>}, {pipeline_mode = #tpu.pipeline_mode<synchronous>, transform_indices = @transform_1, window_bounds = array<i64: 800, 49>}, {transform_indices = @transform_2, window_bounds = array<i64: 128, 2>}, {transform_indices = @transform_3, window_bounds = array<i64: 128, 49>}]} {
    %c0 = arith.constant 0 : index
    %c0_0 = arith.constant 0 : index
    %0 = vector.load %arg1[%c0, %c0_0] : memref<128x800xbf16, #tpu.memory_space<vmem>>, vector<128x800xbf16>
    %c0_1 = arith.constant 0 : index
    %c0_2 = arith.constant 0 : index
    %1 = vector.load %arg2[%c0_1, %c0_2] : memref<800x49xbf16, #tpu.memory_space<vmem>>, vector<800x49xbf16>
    %cst = arith.constant dense<0.000000e+00> : vector<128x49xf32>
    %2 = tpu.matmul %0, %1, %cst {dimension_numbers = #tpu.dot_dimension_numbers<[1], [0], [0], [1], [0, 0, 1, 1], [], []>} : vector<128x800xbf16>, vector<800x49xbf16>, vector<128x49xf32> -> vector<128x49xf32>
    %cst_3 = arith.constant dense<0.000000e+00> : vector<128xf32>
    %3 = vector.multi_reduction <add>, %2, %cst_3 [1] : vector<128x49xf32> to vector<128xf32>
    %4 = vector.shape_cast %3 : vector<128xf32> to vector<128x1xf32>
    %cst_4 = arith.constant 0.0204081628 : f32
    %5 = vector.broadcast %cst_4 : f32 to vector<128x1xf32>
    %6 = arith.mulf %4, %5 : vector<128x1xf32>
    %7 = arith.mulf %2, %2 : vector<128x49xf32>
    %cst_5 = arith.constant dense<0.000000e+00> : vector<128xf32>
    %8 = vector.multi_reduction <add>, %7, %cst_5 [1] : vector<128x49xf32> to vector<128xf32>
    %9 = vector.shape_cast %8 : vector<128xf32> to vector<128x1xf32>
    %cst_6 = arith.constant 0.0204081628 : f32
    %10 = vector.broadcast %cst_6 : f32 to vector<128x1xf32>
    %11 = arith.mulf %9, %10 : vector<128x1xf32>
    %12 = arith.mulf %6, %6 : vector<128x1xf32>
    %13 = arith.subf %11, %12 : vector<128x1xf32>
    %cst_7 = arith.constant 9.99999974E-6 : f32
    %14 = vector.broadcast %cst_7 : f32 to vector<128x1xf32>
    %15 = arith.addf %13, %14 : vector<128x1xf32>
    %16 = math.rsqrt %15 : vector<128x1xf32>
    %c0_8 = arith.constant 0 : index
    %c0_9 = arith.constant 0 : index
    %17 = vector.load %arg3[%c0_8, %c0_9] : memref<128x2xf32, #tpu.memory_space<vmem>>, vector<128x1xf32>
    %c0_10 = arith.constant 0 : index
    %c1 = arith.constant 1 : index
    %18 = vector.load %arg3[%c0_10, %c1] : memref<128x2xf32, #tpu.memory_space<vmem>>, vector<128x1xf32>
    %19 = arith.mulf %17, %16 : vector<128x1xf32>
    %20 = arith.mulf %6, %19 : vector<128x1xf32>
    %21 = arith.subf %18, %20 : vector<128x1xf32>
    %22 = vector.broadcast %19 : vector<128x1xf32> to vector<128x49xf32>
    %23 = arith.mulf %2, %22 : vector<128x49xf32>
    %24 = vector.broadcast %21 : vector<128x1xf32> to vector<128x49xf32>
    %25 = arith.addf %23, %24 : vector<128x49xf32>
    %c0_11 = arith.constant 0 : index
    %c0_12 = arith.constant 0 : index
    %26 = vector.load %arg4[%c0_11, %c0_12] : memref<128x49xf32, #tpu.memory_space<vmem>>, vector<128x49xf32>
    tpu.vector_store %arg4[%c0_11, %c0_12], %25 {strides = array<i32>} : memref<128x49xf32, #tpu.memory_space<vmem>>, vector<128x49xf32>,
    return
  }
  func.func @transform_0(%arg0: i32) -> (i32, i32) {
    %c0_i32 = arith.constant 0 : i32
    %c0_i32_0 = arith.constant 0 : i32
    return %arg0, %c0_i32 : i32, i32
  }
  func.func @transform_1(%arg0: i32) -> (i32, i32) {
    %c0_i32 = arith.constant 0 : i32
    %c0_i32_0 = arith.constant 0 : i32
    %c0_i32_1 = arith.constant 0 : i32
    return %c0_i32, %c0_i32_0 : i32, i32
  }
  func.func @transform_2(%arg0: i32) -> (i32, i32) {
    %c0_i32 = arith.constant 0 : i32
    %c0_i32_0 = arith.constant 0 : i32
    return %arg0, %c0_i32 : i32, i32
  }
  func.func @transform_3(%arg0: i32) -> (i32, i32) {
    %c0_i32 = arith.constant 0 : i32
    %c0_i32_0 = arith.constant 0 : i32
    return %arg0, %c0_i32 : i32, i32
  }
}

</mosaic_0001>

<bundles_post_ra>
// kernel: conv1x1_bn.1
= control target key start
LH: loop header
LB: loop body
LE: loop exit
PB: predicated region body
PF: predicated region fallthrough
CT: control target
= control target key end

     0   :  { %vm759_vm0 = vcmask 261120   ;;  %vm1172_vm1 = vcmask 400384   ;;  %s2243_s13 = smov 1   ;;  %s3048_s1 = inlined_call_operand.vmem [shape: bf16[800,49], index: 1, kind: input, shape index: {}]   ;;  %s3049_s0 = inlined_call_operand.vmem [shape: bf16[128,800], index: 0, kind: input, shape index: {}]   ;;  %s3050_s2 = inlined_call_operand.vmem [shape: f32[128,2], index: 2, kind: input, shape index: {}]   ;;  %s3051_s3 = inlined_call_operand.vmem [shape: f32[128,49], index: 3, kind: output, shape index: {}]  }
   0x1   :  { %v2080_v0 = vld [vmem:[%s3048_s1 + $0x40] sm:$0xff]   ;;  %v2084_v4 = vld [vmem:[%s3048_s1 + $0x48] sm:$0xff]   ;;  %v2088_v8 = vld [vmem:[%s3048_s1 + $0x50] sm:$0xff]  }
   0x2   :  { %v2081_v1 = vld [vmem:[%s3048_s1 + $0xc0] sm:$0xff]   ;;  %1835 = vmatprep.subr.bf16.mxu0 %v2080_v0  ;;  %v2085_v5 = vld [vmem:[%s3048_s1 + $0xc8] sm:$0xff]   ;;  %v2089_v9 = vld [vmem:[%s3048_s1 + $0xd0] sm:$0xff]  }
   0x3   :  { %v2082_v2 = vld [vmem:[%s3048_s1] sm:$0xff]   ;;  %1899 = vmatprep.subr.bf16.mxu1 %v2081_v1  ;;  %v2086_v6 = vld [vmem:[%s3048_s1 + $0x8] sm:$0xff]   ;;  %v2090_v10 = vld [vmem:[%s3048_s1 + $0x10] sm:$0xff]  }
   0x4   :  { %v2083_v3 = vld [vmem:[%s3048_s1 + $0x80] sm:$0xff]   ;;  %1836 = vmatpush3.bf16.msra.mxu0 %v2082_v2  ;;  %v2087_v7 = vld [vmem:[%s3048_s1 + $0x88] sm:$0xff]   ;;  %v2091_v11 = vld [vmem:[%s3048_s1 + $0x90] sm:$0xff]  }
   0x5   :  { %1900 = vmatpush3.bf16.msra.mxu1 %v2083_v3  ;;  %1837 = vmatprep.subr.bf16.mxu0 %v2084_v4  ;;  %v2092_v12 = vld [vmem:[%s3048_s1 + $0x58] sm:$0xff]   ;;  %v2096_v16 = vld [vmem:[%s3048_s1 + $0x60] sm:$0xff]   ;;  %v2100_v20 = vld [vmem:[%s3048_s1 + $0x68] sm:$0xff]  }
   0x6   :  { %1901 = vmatprep.subr.bf16.mxu1 %v2085_v5  ;;  %v2093_v13 = vld [vmem:[%s3048_s1 + $0xd8] sm:$0xff]   ;;  %v2097_v17 = vld [vmem:[%s3048_s1 + $0xe0] sm:$0xff]   ;;  %v2101_v21 = vld [vmem:[%s3048_s1 + $0xe8] sm:$0xff]  }
   0x7   :  { %v2094_v14 = vld [vmem:[%s3048_s1 + $0x18] sm:$0xff]   ;;  %v2098_v18 = vld [vmem:[%s3048_s1 + $0x20] sm:$0xff]   ;;  %v2102_v22 = vld [vmem:[%s3048_s1 + $0x28] sm:$0xff]  }
   0x8   :  { %1838 = vmatpush3.bf16.msra.mxu0 %v2086_v6  ;;  %v2095_v15 = vld [vmem:[%s3048_s1 + $0x98] sm:$0xff]   ;;  %v2099_v19 = vld [vmem:[%s3048_s1 + $0xa0] sm:$0xff]   ;;  %v2103_v23 = vld [vmem:[%s3048_s1 + $0xa8] sm:$0xff]  }
   0x9   :  { %1902 = vmatpush3.bf16.msra.mxu1 %v2087_v7  ;;  %1839 = vmatprep.subr.bf16.mxu0 %v2088_v8  ;;  %v2104_v24 = vld [vmem:[%s3048_s1 + $0x70] sm:$0xff]   ;;  %v2108_v28 = vld [vmem:[%s3048_s1 + $0x78] sm:$0xff]   ;;  %v2114_v33 = vld [vmem:[%s3049_s0 + $0x4] ss:$28 sps:$4 sm:$0xff]  }
   0xa   :  { %1903 = vmatprep.subr.bf16.mxu1 %v2089_v9  ;;  %v2105_v25 = vld [vmem:[%s3048_s1 + $0xf0] sm:$0xff]   ;;  %v2109_v29 = vld [vmem:[%s3048_s1 + $0xf8] sm:$0xff]   ;;  %v2115_v34 = vld [vmem:[%s3049_s0 + $0x8] ss:$28 sps:$4 sm:$0xff]   ;;  %816 = vmatprep.mubr.bf16.mxu0 %v2114_v33 }
   0xb   :  { %v2106_v26 = vld [vmem:[%s3048_s1 + $0x30] sm:$0xff]   ;;  %v2110_v30 = vld [vmem:[%s3048_s1 + $0x38] sm:$0xff]   ;;  %v2117_v35 = vld [vmem:[%s3049_s0 + $0xc] ss:$28 sps:$4 sm:$0xff]  }
   0xc   :  { %1840 = vmatpush3.bf16.msra.mxu0 %v2090_v10  ;;  %v2107_v27 = vld [vmem:[%s3048_s1 + $0xb0] sm:$0xff]   ;;  %v2111_v31 = vld [vmem:[%s3048_s1 + $0xb8] sm:$0xff]   ;;  %v2118_v36 = vld [vmem:[%s3048_s1 + $0x140] sm:$0xff]   ;;  %913 = vmatprep.mubr.bf16.mxu1 %v2117_v35 }
   0xd   :  { %1904 = vmatpush3.bf16.msra.mxu1 %v2091_v11  ;;  %1841 = vmatprep.subr.bf16.mxu0 %v2092_v12  ;;  %v2112_v32 = vld [vmem:[%s3049_s0] ss:$28 sps:$4 sm:$0xff]   ;;  %v2124_v40 = vld [vmem:[%s3049_s0 + $0x38] ss:$28 sps:$4 sm:$0xff]   ;;  %v2126_v42 = vld [vmem:[%s3048_s1 + $0x148] sm:$0xff]  }
   0xe   :  { %1905 = vmatprep.subr.bf16.mxu1 %v2093_v13  ;;  %v2119_v37 = vld [vmem:[%s3048_s1 + $0x100] sm:$0xff]   ;;  %v2120_v38 = vld [vmem:[%s3049_s0 + $0x3c] ss:$28 sps:$4 sm:$0xff]   ;;  %v2127_v43 = vld [vmem:[%s3048_s1 + $0x108] sm:$0xff]  }
   0xf   :  { %v2122_v39 = vld [vmem:[%s3049_s0 + $0x44] ss:$28 sps:$4 sm:$0xff]   ;;  %v2128_v44 = vld [vmem:[%s3049_s0 + $0x74] ss:$28 sps:$4 sm:$0xff]   ;;  %v2130_v45 = vld [vmem:[%s3049_s0 + $0x7c] ss:$28 sps:$4 sm:$0xff]  }
  0x10   :  { %1842 = vmatpush3.bf16.msra.mxu0 %v2094_v14  ;;  %v2125_v41 = vld [vmem:[%s3049_s0 + $0x40] ss:$28 sps:$4 sm:$0xff]   ;;  %v2134_v46 = vld [vmem:[%s3048_s1 + $0x150] sm:$0xff]   ;;  %v2136_v50 = vld [vmem:[%s3049_s0 + $0xac] ss:$28 sps:$4 sm:$0xff]  }
  0x11   :  { %1906 = vmatpush3.bf16.msra.mxu1 %v2095_v15  ;;  %1843 = vmatprep.subr.bf16.mxu0 %v2096_v16  ;;  %v2135_v47 = vld [vmem:[%s3048_s1 + $0x110] sm:$0xff]   ;;  %v2142_v52 = vld [vmem:[%s3048_s1 + $0x158] sm:$0xff]   ;;  %v2150_v54 = vld [vmem:[%s3048_s1 + $0x160] sm:$0xff]  }
  0x12   :  { %1907 = vmatprep.subr.bf16.mxu1 %v2097_v17  ;;  %v2132_v48 = vld [vmem:[%s3049_s0 + $0x70] ss:$28 sps:$4 sm:$0xff]   ;;  %v2133_v49 = vld [vmem:[%s3049_s0 + $0x78] ss:$28 sps:$4 sm:$0xff]   ;;  %v2151_v55 = vld [vmem:[%s3048_s1 + $0x120] sm:$0xff]  }
  0x13   :  { %v2138_v51 = vld [vmem:[%s3049_s0 + $0xb4] ss:$28 sps:$4 sm:$0xff]   ;;  %v2143_v53 = vld [vmem:[%s3048_s1 + $0x118] sm:$0xff]   ;;  %v2140_v56 = vld [vmem:[%s3049_s0 + $0xa8] ss:$28 sps:$4 sm:$0xff]  }
  0x14   :  { %1844 = vmatpush3.bf16.msra.mxu0 %v2098_v18  ;;  %v2141_v57 = vld [vmem:[%s3049_s0 + $0xb0] ss:$28 sps:$4 sm:$0xff]   ;;  %v2144_v58 = vld [vmem:[%s3049_s0 + $0xe4] ss:$28 sps:$4 sm:$0xff]   ;;  %v2152_v2 = vld [vmem:[%s3049_s0 + $0x11c] ss:$28 sps:$4 sm:$0xff]  }
  0x15   :  { %1908 = vmatpush3.bf16.msra.mxu1 %v2099_v19  ;;  %1845 = vmatprep.subr.bf16.mxu0 %v2100_v20  ;;  %v2146_v59 = vld [vmem:[%s3049_s0 + $0xec] ss:$28 sps:$4 sm:$0xff]   ;;  %v2148_v62 = vld [vmem:[%s3049_s0 + $0xe0] ss:$28 sps:$4 sm:$0xff]   ;;  %v2166_v0 = vld [vmem:[%s3048_s1 + $0x170] sm:$0xff]  }
  0x16   :  { %1909 = vmatprep.subr.bf16.mxu1 %v2101_v21  ;;  %v2158_v60 = vld [vmem:[%s3048_s1 + $0x168] sm:$0xff]   ;;  %v2167_v1 = vld [vmem:[%s3048_s1 + $0x130] sm:$0xff]   ;;  %v2154_v3 = vld [vmem:[%s3049_s0 + $0x124] ss:$28 sps:$4 sm:$0xff]  }
  0x17   :  { %v2159_v61 = vld [vmem:[%s3048_s1 + $0x128] sm:$0xff]   ;;  %v2174_v4 = vld [vmem:[%s3048_s1 + $0x178] sm:$0xff]   ;;  %v2182_v8 = vld [vmem:[%s3048_s1 + $0x180] sm:$0xff]  }
  0x18   :  { %1846 = vmatpush3.bf16.msra.mxu0 %v2102_v22  ;;  %v2149_v63 = vld [vmem:[%s3049_s0 + $0xe8] ss:$28 sps:$4 sm:$0xff]   ;;  %v2175_v5 = vld [vmem:[%s3048_s1 + $0x138] sm:$0xff]   ;;  %v2160_v9 = vld [vmem:[%s3049_s0 + $0x154] ss:$28 sps:$4 sm:$0xff]  }
  0x19   :  { %1910 = vmatpush3.bf16.msra.mxu1 %v2103_v23  ;;  %1847 = vmatprep.subr.bf16.mxu0 %v2104_v24  ;;  %v2156_v6 = vld [vmem:[%s3049_s0 + $0x118] ss:$28 sps:$4 sm:$0xff]   ;;  %v2157_v7 = vld [vmem:[%s3049_s0 + $0x120] ss:$28 sps:$4 sm:$0xff]   ;;  %v2164_v11 = vld [vmem:[%s3049_s0 + $0x150] ss:$28 sps:$4 sm:$0xff]  }
  0x1a   :  { %1911 = vmatprep.subr.bf16.mxu1 %v2105_v25  ;;  %v2162_v10 = vld [vmem:[%s3049_s0 + $0x15c] ss:$28 sps:$4 sm:$0xff]   ;;  %v2168_v13 = vld [vmem:[%s3049_s0 + $0x18c] ss:$28 sps:$4 sm:$0xff]   ;;  %v2170_v14 = vld [vmem:[%s3049_s0 + $0x194] ss:$28 sps:$4 sm:$0xff]  }
  0x1b   :  { %v2165_v12 = vld [vmem:[%s3049_s0 + $0x158] ss:$28 sps:$4 sm:$0xff]   ;;  %v2172_v15 = vld [vmem:[%s3049_s0 + $0x188] ss:$28 sps:$4 sm:$0xff]   ;;  %v2173_v16 = vld [vmem:[%s3049_s0 + $0x190] ss:$28 sps:$4 sm:$0xff]  }
  0x1c   :  { %1848 = vmatpush3.bf16.msra.mxu0 %v2106_v26  ;;  %v2178_v17 = vld [vmem:[%s3049_s0 + $0x14] ss:$28 sps:$4 sm:$0xff]   ;;  %v2181_v18 = vld [vmem:[%s3049_s0 + $0x164] ss:$28 sps:$4 sm:$0xff]   ;;  %v2183_v21 = vld [vmem:[%s3049_s0 + $0x4c] ss:$28 sps:$4 sm:$0xff]  }
  0x1d   :  { %1912 = vmatpush3.bf16.msra.mxu1 %v2107_v27  ;;  %1849 = vmatprep.subr.bf16.mxu0 %v2108_v28  ;;  %v2176_v19 = vld [vmem:[%s3049_s0 + $0x10] ss:$28 sps:$4 sm:$0xff]   ;;  %v2179_v20 = vld [vmem:[%s3049_s0 + $0x160] ss:$28 sps:$4 sm:$0xff]   ;;  %v2187_v24 = vld [vmem:[%s3049_s0 + $0x48] ss:$28 sps:$4 sm:$0xff]  }
  0x1e   :  { %1913 = vmatprep.subr.bf16.mxu1 %v2109_v29  ;;  %v2185_v22 = vld [vmem:[%s3049_s0 + $0x19c] ss:$28 sps:$4 sm:$0xff]   ;;  %v2189_v23 = vld [vmem:[%s3048_s1 + $0x188] sm:$0xff]   ;;  %v2190_v26 = vld [vmem:[%s3049_s0 + $0x84] ss:$28 sps:$4 sm:$0xff]  }
  0x1f   :  { %v2188_v25 = vld [vmem:[%s3049_s0 + $0x198] ss:$28 sps:$4 sm:$0xff]   ;;  %v2193_v28 = vld [vmem:[%s3049_s0 + $0x80] ss:$28 sps:$4 sm:$0xff]   ;;  %v2194_v29 = vld [vmem:[%s3049_s0 + $0x50] ss:$28 sps:$4 sm:$0xff]  }
  0x20   :  { %1850 = vmatpush3.bf16.msra.mxu0 %v2110_v30  ;;  %v2192_v27 = vld [vmem:[%s3049_s0 + $0x18] ss:$28 sps:$4 sm:$0xff]   ;;  %v2199_v33 = vld [vmem:[%s3049_s0 + $0xc0] ss:$28 sps:$4 sm:$0xff]  }
  0x21   :  { %1914 = vmatpush3.bf16.msra.mxu1 %v2111_v31  ;;  %1963 = vmatprep.subr.bf16.mxu0 %v2118_v36  ;;  %v2195_v30 = vld [vmem:[%s3049_s0 + $0xbc] ss:$28 sps:$4 sm:$0xff]   ;;  %v2197_v31 = vld [vmem:[%s3049_s0 + $0x88] ss:$28 sps:$4 sm:$0xff]  }
  0x22   :  { %2057 = vmatprep.subr.bf16.mxu1 %v2118_v36  ;;  %v2202_v35 = vld [vmem:[%s3049_s0 + $0xf8] ss:$28 sps:$4 sm:$0xff]   ;;  %v2203_v36 = vld [vmem:[%s3049_s0 + $0xf0] ss:$28 sps:$4 sm:$0xff]  }
  0x23   :  { %817 = vmatmul.mubr.bf16.vlgmr.msra.gmra.mrb[0].mxu0 %v2112_v32  ;;  %v2198_v32 = vld [vmem:[%s3049_s0 + $0xb8] ss:$28 sps:$4 sm:$0xff]  }
  0x24   :  { %914 = vmatmul.mubr.bf16.vlgmr.msra.gmra.mrb[0].mxu1 %v2115_v34  ;;  %1964 = vmatpush3.bf16.msra.mxu0 %v2119_v37  ;;  %v2200_v34 = vld [vmem:[%s3049_s0 + $0xf4] ss:$28 sps:$4 sm:$0xff]  }
  0x25   :  { %2065 = vmatpush3.bf16.msra.mxu1 %v2119_v37  ;;  %824 = vmatprep.mubr.bf16.mxu0 %v2120_v38  ;;  %v2204_v37 = vld [vmem:[%s3049_s0 + $0x130] ss:$28 sps:$4 sm:$0xff]  }
  0x26   :  { %921 = vmatprep.mubr.bf16.mxu1 %v2122_v39  ;;  %2058 = vmatprep.subr.bf16.mxu1 %v2126_v42  ;;  %v2205_v38 = vld [vmem:[%s3049_s0 + $0x12c] ss:$28 sps:$4 sm:$0xff]  }
  0x27   :  { %1965 = vmatprep.subr.bf16.mxu0 %v2126_v42  ;;  %v2207_v39 = vld [vmem:[%s3049_s0 + $0x168] ss:$28 sps:$4 sm:$0xff]  }
  0x28   :  { %1966 = vmatpush3.bf16.msra.mxu0 %v2127_v43 }
  0x29   :  { %2066 = vmatpush3.bf16.msra.mxu1 %v2127_v43  ;;  %1967 = vmatprep.subr.bf16.mxu0 %v2134_v46 }
  0x2a   :  { %2059 = vmatprep.subr.bf16.mxu1 %v2134_v46 }
  0x2b   :  { %825 = vmatmul.mubr.bf16.gmra.mrb[4].mxu0 %v2124_v40  ;;  %v2208_v40 = vld [vmem:[%s3049_s0 + $0x128] ss:$28 sps:$4 sm:$0xff]  }
  0x2c   :  { %922 = vmatmul.mubr.bf16.gmra.mrb[4].mxu1 %v2125_v41  ;;  %832 = vmatprep.mubr.bf16.mxu0 %v2128_v44  ;;  %v2209_v41 = vld [vmem:[%s3049_s0 + $0x1a0] ss:$28 sps:$4 sm:$0xff]  }
  0x2d   :  { %929 = vmatprep.mubr.bf16.mxu1 %v2130_v45  ;;  %2067 = vmatpush3.bf16.msra.mxu1 %v2135_v47 }
  0x2e   :  { %1968 = vmatpush3.bf16.msra.mxu0 %v2135_v47  ;;  %2060 = vmatprep.subr.bf16.mxu1 %v2142_v52 }
  0x2f   :  { %1969 = vmatprep.subr.bf16.mxu0 %v2142_v52 }
  0x31   :  { %2068 = vmatpush3.bf16.msra.mxu1 %v2143_v53 }
  0x32   :  { %1970 = vmatpush3.bf16.msra.mxu0 %v2143_v53  ;;  %2061 = vmatprep.subr.bf16.mxu1 %v2150_v54 }
  0x33   :  { %833 = vmatmul.mubr.bf16.gmra.mrb[8].mxu0 %v2132_v48  ;;  %1971 = vmatprep.subr.bf16.mxu0 %v2150_v54 }
  0x34   :  { %930 = vmatmul.mubr.bf16.gmra.mrb[8].mxu1 %v2133_v49  ;;  %840 = vmatprep.mubr.bf16.mxu0 %v2136_v50 }
  0x35   :  { %937 = vmatprep.mubr.bf16.mxu1 %v2138_v51  ;;  %2069 = vmatpush3.bf16.msra.mxu1 %v2151_v55 }
  0x36   :  { %1972 = vmatpush3.bf16.msra.mxu0 %v2151_v55  ;;  %2062 = vmatprep.subr.bf16.mxu1 %v2158_v60 }
  0x37   :  { %1973 = vmatprep.subr.bf16.mxu0 %v2158_v60 }
  0x39   :  { %2070 = vmatpush3.bf16.msra.mxu1 %v2159_v61 }
  0x3a   :  { %1974 = vmatpush3.bf16.msra.mxu0 %v2159_v61  ;;  %2063 = vmatprep.subr.bf16.mxu1 %v2166_v0 }
  0x3b   :  { %841 = vmatmul.mubr.bf16.gmra.mrb[12].mxu0 %v2140_v56  ;;  %1975 = vmatprep.subr.bf16.mxu0 %v2166_v0 }
  0x3c   :  { %938 = vmatmul.mubr.bf16.gmra.mrb[12].mxu1 %v2141_v57  ;;  %848 = vmatprep.mubr.bf16.mxu0 %v2144_v58 }
  0x3d   :  { %945 = vmatprep.mubr.bf16.mxu1 %v2146_v59  ;;  %2071 = vmatpush3.bf16.msra.mxu1 %v2167_v1 }
  0x3e   :  { %1976 = vmatpush3.bf16.msra.mxu0 %v2167_v1  ;;  %2064 = vmatprep.subr.bf16.mxu1 %v2174_v4 }
  0x3f   :  { %1977 = vmatprep.subr.bf16.mxu0 %v2174_v4 }
  0x41   :  { %2072 = vmatpush3.bf16.msra.mxu1 %v2175_v5 }
  0x42   :  { %1978 = vmatpush3.bf16.msra.mxu0 %v2175_v5  ;;  %2037 = vmatprep.subr.bf16.mxu1 %v2182_v8 }
  0x43   :  { %849 = vmatmul.mubr.bf16.gmra.mrb[16].mxu0 %v2148_v62 }
  0x44   :  { %946 = vmatmul.mubr.bf16.gmra.mrb[16].mxu1 %v2149_v63  ;;  %856 = vmatprep.mubr.bf16.mxu0 %v2152_v2 }
  0x45   :  { %953 = vmatprep.mubr.bf16.mxu1 %v2154_v3 }
  0x4b   :  { %857 = vmatmul.mubr.bf16.gmra.mrb[20].mxu0 %v2156_v6 }
  0x4c   :  { %954 = vmatmul.mubr.bf16.gmra.mrb[20].mxu1 %v2157_v7  ;;  %864 = vmatprep.mubr.bf16.mxu0 %v2160_v9 }
  0x4d   :  { %961 = vmatprep.mubr.bf16.mxu1 %v2162_v10 }
  0x53   :  { %865 = vmatmul.mubr.bf16.gmra.mrb[24].mxu0 %v2164_v11 }
  0x54   :  { %962 = vmatmul.mubr.bf16.gmra.mrb[24].mxu1 %v2165_v12  ;;  %872 = vmatprep.mubr.bf16.mxu0 %v2168_v13 }
  0x55   :  { %969 = vmatprep.mubr.bf16.mxu1 %v2170_v14 }
  0x5b   :  { %873 = vmatmul.mubr.bf16.gmra.mrb[28].mxu0 %v2172_v15 }
  0x5c   :  { %970 = vmatmul.mubr.bf16.gmra.mrb[28].mxu1 %v2173_v16  ;;  %1010 = vmatprep.mubr.bf16.mxu0 %v2178_v17 }
  0x5d   :  { %1058 = vmatprep.mubr.bf16.mxu1 %v2181_v18 }
  0x63   :  { %1011 = vmatmul.mubr.bf16.vlgmr.msra.gmra.mrb[32].mxu0 %v2176_v19 }
  0x64   :  { %1059 = vmatmul.mubr.bf16.vlgmr.msra.gmra.mrb[32].mxu1 %v2179_v20  ;;  %1018 = vmatprep.mubr.bf16.mxu0 %v2183_v21 }
  0x65   :  { %2038 = vmatpush3.bf16.msra.mxu1 %v2182_v8  ;;  %1066 = vmatprep.mubr.bf16.mxu1 %v2185_v22 }
  0x66   :  { %2039 = vmatprep.subr.bf16.mxu1 %v2189_v23 }
  0x69   :  { %2040 = vmatpush3.bf16.msra.mxu1 %v2189_v23 }
  0x6b   :  { %1019 = vmatmul.mubr.bf16.gmra.mrb[36].mxu0 %v2187_v24 }
  0x6c   :  { %1067 = vmatmul.mubr.bf16.gmra.mrb[36].mxu1 %v2188_v25  ;;  %1026 = vmatprep.mubr.bf16.mxu0 %v2190_v26 }
  0x6d   :  { %2041 = vmatprep.mubr.msk.bf16.mxu1 %vm759_vm0, %v2192_v27 }
  0x73   :  { %1027 = vmatmul.mubr.bf16.gmra.mrb[40].mxu0 %v2193_v28 }
  0x74   :  { %2042 = vmatmul.mubr.msk.bf16.vlgmr.msra.gmra.mrb[40].mxu1 %vm759_vm0, %v2194_v29  ;;  %1034 = vmatprep.mubr.bf16.mxu0 %v2195_v30 }
  0x75   :  { %2045 = vmatprep.mubr.msk.bf16.mxu1 %vm759_vm0, %v2197_v31 }
  0x7b   :  { %1035 = vmatmul.mubr.bf16.gmra.mrb[44].mxu0 %v2198_v32 }
  0x7c   :  { %2046 = vmatmul.mubr.msk.bf16.gmra.mrb[44].mxu1 %vm759_vm0, %v2199_v33  ;;  %1042 = vmatprep.mubr.bf16.mxu0 %v2200_v34 }
  0x7d   :  { %2049 = vmatprep.mubr.msk.bf16.mxu1 %vm759_vm0, %v2202_v35 }
  0x83   :  { %1043 = vmatmul.mubr.bf16.gmra.mrb[48].mxu0 %v2203_v36 }
  0x84   :  { %2050 = vmatmul.mubr.msk.bf16.gmra.mrb[48].mxu1 %vm759_vm0, %v2204_v37  ;;  %1050 = vmatprep.mubr.bf16.mxu0 %v2205_v38 }
  0x85   :  { %2053 = vmatprep.mubr.msk.bf16.mxu1 %vm759_vm0, %v2207_v39 }
  0x8b   :  { %1051 = vmatmul.mubr.bf16.gmra.mrb[52].mxu0 %v2208_v40 }
  0x8c   :  { %2054 = vmatmul.mubr.msk.bf16.gmra.mrb[52].mxu1 %vm759_vm0, %v2209_v41 }
  0xf6   :  { %v1851_v42 = vpop.f32.mrb[0].mxu0 }
  0xf7   :  { %v1915_v43 = vpop.f32.mrb[0].mxu1  ;;  %v1852_v44 = vpop.f32.mrb[1].mxu0 }
  0xf8   :  { %v1853_v45 = vadd.f32 %v1852_v44, %v1851_v42  ;;  %v1916_v46 = vpop.f32.mrb[1].mxu1  ;;  %v1854_v47 = vpop.f32.mrb[2].mxu0 }
  0xf9   :  { %v1917_v48 = vadd.f32 %v1916_v46, %v1915_v43  ;;  %v1918_v49 = vpop.f32.mrb[2].mxu1  ;;  %v1855_v50 = vpop.f32.mrb[3].mxu0 }
  0xfa   :  { %v1856_v51 = vadd.f32 %v1855_v50, %v1854_v47  ;;  %v1919_v52 = vpop.f32.mrb[3].mxu1 }
  0xfb   :  { %v2591_v53 = vadd.f32 %v1917_v48, %v1853_v45  ;;  %v1920_v54 = vadd.f32 %v1919_v52, %v1918_v49 }
  0xfd   :  { %v2593_v55 = vadd.f32 %v1920_v54, %v1856_v51 }
  0xfe   :  { %v1857_v56 = vpop.f32.mrb[4].mxu0 }
  0xff   :  { %v1921_v57 = vpop.f32.mrb[4].mxu1  ;;  %v1858_v58 = vpop.f32.mrb[5].mxu0 }
 0x100   :  { %v1859_v59 = vadd.f32 %v1858_v58, %v1857_v56  ;;  %v1922_v60 = vpop.f32.mrb[5].mxu1  ;;  %v1860_v61 = vpop.f32.mrb[6].mxu0 }
 0x101   :  { %v1923_v62 = vadd.f32 %v1922_v60, %v1921_v57  ;;  %v1924_v63 = vpop.f32.mrb[6].mxu1  ;;  %v1861_v0 = vpop.f32.mrb[7].mxu0 }
 0x102   :  { %v1862_v1 = vadd.f32 %v1861_v0, %v1860_v61  ;;  %v1925_v2 = vpop.f32.mrb[7].mxu1 }
 0x103   :  { %v2595_v3 = vadd.f32 %v1923_v62, %v1859_v59  ;;  %v1926_v4 = vadd.f32 %v1925_v2, %v1924_v63 }
 0x105   :  { %v2597_v5 = vadd.f32 %v1926_v4, %v1862_v1 }
 0x106   :  { %v1863_v6 = vpop.f32.mrb[8].mxu0 }
 0x107   :  { %v1927_v7 = vpop.f32.mrb[8].mxu1  ;;  %v1864_v8 = vpop.f32.mrb[9].mxu0 }
 0x108   :  { %v1865_v9 = vadd.f32 %v1864_v8, %v1863_v6  ;;  %v1928_v10 = vpop.f32.mrb[9].mxu1  ;;  %v1866_v11 = vpop.f32.mrb[10].mxu0 }
 0x109   :  { %v1929_v12 = vadd.f32 %v1928_v10, %v1927_v7  ;;  %v1930_v13 = vpop.f32.mrb[10].mxu1  ;;  %v1867_v14 = vpop.f32.mrb[11].mxu0 }
 0x10a   :  { %v1868_v15 = vadd.f32 %v1867_v14, %v1866_v11  ;;  %v1931_v16 = vpop.f32.mrb[11].mxu1 }
 0x10b   :  { %v2599_v17 = vadd.f32 %v1929_v12, %v1865_v9  ;;  %v1932_v18 = vadd.f32 %v1931_v16, %v1930_v13 }
 0x10d   :  { %v2601_v19 = vadd.f32 %v1932_v18, %v1868_v15 }
 0x10e   :  { %v1869_v20 = vpop.f32.mrb[12].mxu0 }
 0x10f   :  { %v1933_v21 = vpop.f32.mrb[12].mxu1  ;;  %v1870_v22 = vpop.f32.mrb[13].mxu0 }
 0x110   :  { %v1871_v23 = vadd.f32 %v1870_v22, %v1869_v20  ;;  %v1934_v24 = vpop.f32.mrb[13].mxu1  ;;  %v1872_v25 = vpop.f32.mrb[14].mxu0 }
 0x111   :  { %v1935_v26 = vadd.f32 %v1934_v24, %v1933_v21  ;;  %v1936_v27 = vpop.f32.mrb[14].mxu1  ;;  %v1873_v28 = vpop.f32.mrb[15].mxu0 }
 0x112   :  { %v1874_v29 = vadd.f32 %v1873_v28, %v1872_v25  ;;  %v1937_v30 = vpop.f32.mrb[15].mxu1 }
 0x113   :  { %v2603_v31 = vadd.f32 %v1935_v26, %v1871_v23  ;;  %v1938_v32 = vadd.f32 %v1937_v30, %v1936_v27 }
 0x115   :  { %v2605_v33 = vadd.f32 %v1938_v32, %v1874_v29 }
 0x116   :  { %v1875_v34 = vpop.f32.mrb[16].mxu0 }
 0x117   :  { %v1939_v35 = vpop.f32.mrb[16].mxu1  ;;  %v1876_v36 = vpop.f32.mrb[17].mxu0 }
 0x118   :  { %v1877_v37 = vadd.f32 %v1876_v36, %v1875_v34  ;;  %v1940_v38 = vpop.f32.mrb[17].mxu1  ;;  %v1878_v39 = vpop.f32.mrb[18].mxu0 }
 0x119   :  { %v1941_v40 = vadd.f32 %v1940_v38, %v1939_v35  ;;  %v1942_v41 = vpop.f32.mrb[18].mxu1  ;;  %v1879_v42 = vpop.f32.mrb[19].mxu0 }
 0x11a   :  { %v1880_v43 = vadd.f32 %v1879_v42, %v1878_v39  ;;  %v1943_v44 = vpop.f32.mrb[19].mxu1 }
 0x11b   :  { %v2607_v45 = vadd.f32 %v1941_v40, %v1877_v37  ;;  %v1944_v46 = vadd.f32 %v1943_v44, %v1942_v41 }
 0x11d   :  { %v2609_v47 = vadd.f32 %v1944_v46, %v1880_v43 }
 0x11e   :  { %v1881_v48 = vpop.f32.mrb[20].mxu0 }
 0x11f   :  { %v1945_v49 = vpop.f32.mrb[20].mxu1  ;;  %v1882_v50 = vpop.f32.mrb[21].mxu0 }
 0x120   :  { %v1883_v51 = vadd.f32 %v1882_v50, %v1881_v48  ;;  %v1946_v52 = vpop.f32.mrb[21].mxu1  ;;  %v1884_v54 = vpop.f32.mrb[22].mxu0 }
 0x121   :  { %v1947_v56 = vadd.f32 %v1946_v52, %v1945_v49  ;;  %v1948_v57 = vpop.f32.mrb[22].mxu1  ;;  %v1885_v58 = vpop.f32.mrb[23].mxu0 }
 0x122   :  { %v1886_v59 = vadd.f32 %v1885_v58, %v1884_v54  ;;  %v1949_v60 = vpop.f32.mrb[23].mxu1 }
 0x123   :  { %v2611_v61 = vadd.f32 %v1947_v56, %v1883_v51  ;;  %v1950_v62 = vadd.f32 %v1949_v60, %v1948_v57 }
 0x125   :  { %v2613_v63 = vadd.f32 %v1950_v62, %v1886_v59 }
 0x126   :  { %v1887_v0 = vpop.f32.mrb[24].mxu0 }
 0x127   :  { %v1951_v1 = vpop.f32.mrb[24].mxu1  ;;  %v1888_v2 = vpop.f32.mrb[25].mxu0 }
 0x128   :  { %v1889_v4 = vadd.f32 %v1888_v2, %v1887_v0  ;;  %v1952_v6 = vpop.f32.mrb[25].mxu1  ;;  %v1890_v7 = vpop.f32.mrb[26].mxu0 }
 0x129   :  { %v1953_v8 = vadd.f32 %v1952_v6, %v1951_v1  ;;  %v1954_v9 = vpop.f32.mrb[26].mxu1  ;;  %v1891_v10 = vpop.f32.mrb[27].mxu0 }
 0x12a   :  { %v1892_v11 = vadd.f32 %v1891_v10, %v1890_v7  ;;  %v1955_v12 = vpop.f32.mrb[27].mxu1 }
 0x12b   :  { %v964_v13 = vadd.f32 %v1953_v8, %v1889_v4  ;;  %v1956_v14 = vadd.f32 %v1955_v12, %v1954_v9 }
 0x12d   :  { %v967_v15 = vadd.f32 %v1956_v14, %v1892_v11 }
 0x12e   :  { %v1893_v16 = vpop.f32.mrb[28].mxu0 }
 0x12f   :  { %v1957_v18 = vpop.f32.mrb[28].mxu1  ;;  %v1894_v20 = vpop.f32.mrb[29].mxu0 }
 0x130   :  { %v1895_v21 = vadd.f32 %v1894_v20, %v1893_v16  ;;  %v1958_v22 = vpop.f32.mrb[29].mxu1  ;;  %v1896_v23 = vpop.f32.mrb[30].mxu0 }
 0x131   :  { %v1959_v24 = vadd.f32 %v1958_v22, %v1957_v18  ;;  %v1960_v25 = vpop.f32.mrb[30].mxu1  ;;  %v1897_v26 = vpop.f32.mrb[31].mxu0 }
 0x132   :  { %v1898_v27 = vadd.f32 %v1897_v26, %v1896_v23  ;;  %v1961_v28 = vpop.f32.mrb[31].mxu1 }
 0x133   :  { %v972_v29 = vadd.f32 %v1959_v24, %v1895_v21  ;;  %v1962_v30 = vadd.f32 %v1961_v28, %v1960_v25 }
 0x135   :  { %v975_v32 = vadd.f32 %v1962_v30, %v1898_v27 }
 0x136   :  { %v1979_v34 = vpop.f32.mrb[32].mxu0 }
 0x137   :  { %v2015_v35 = vpop.f32.mrb[32].mxu1  ;;  %v1980_v36 = vpop.f32.mrb[33].mxu0 }
 0x138   :  { %v1981_v37 = vadd.f32 %v1980_v36, %v1979_v34  ;;  %v2016_v38 = vpop.f32.mrb[33].mxu1  ;;  %v1982_v39 = vpop.f32.mrb[34].mxu0 }
 0x139   :  { %v2017_v40 = vadd.f32 %v2016_v38, %v2015_v35  ;;  %v2018_v41 = vpop.f32.mrb[34].mxu1  ;;  %v1983_v42 = vpop.f32.mrb[35].mxu0 }
 0x13a   :  { %v1984_v43 = vadd.f32 %v1983_v42, %v1982_v39  ;;  %v2019_v44 = vpop.f32.mrb[35].mxu1  ;;  %v1013_v46 = vadd.f32 %v1981_v37, %v2591_v53 }
 0x13b   :  { %v2020_v48 = vadd.f32 %v2019_v44, %v2018_v41  ;;  %v2616_v49 = vadd.f32 %v2017_v40, %v964_v13 }
 0x13c   :  { %v1016_v50 = vadd.f32 %v1984_v43, %v2593_v55 }
 0x13d   :  { %v2619_v51 = vadd.f32 %v2020_v48, %v967_v15 }
 0x13e   :  { %v1985_v52 = vpop.f32.mrb[36].mxu0 }
 0x13f   :  { %v2021_v54 = vpop.f32.mrb[36].mxu1  ;;  %v1986_v56 = vpop.f32.mrb[37].mxu0 }
 0x140   :  { %v1987_v57 = vadd.f32 %v1986_v56, %v1985_v52  ;;  %v2022_v58 = vpop.f32.mrb[37].mxu1  ;;  %v1988_v59 = vpop.f32.mrb[38].mxu0 }
 0x141   :  { %v2023_v60 = vadd.f32 %v2022_v58, %v2021_v54  ;;  %v2024_v62 = vpop.f32.mrb[38].mxu1  ;;  %v1989_v0 = vpop.f32.mrb[39].mxu0 }
 0x142   :  { %v1990_v1 = vadd.f32 %v1989_v0, %v1988_v59  ;;  %v2025_v2 = vpop.f32.mrb[39].mxu1  ;;  %v1021_v53 = vadd.f32 %v1987_v57, %v2595_v3 }
 0x143   :  { %v2026_v4 = vadd.f32 %v2025_v2, %v2024_v62  ;;  %v2622_v6 = vadd.f32 %v2023_v60, %v972_v29 }
 0x144   :  { %v1024_v55 = vadd.f32 %v1990_v1, %v2597_v5 }
 0x145   :  { %v2625_v7 = vadd.f32 %v2026_v4, %v975_v32 }
 0x146   :  { %v1991_v8 = vpop.f32.mrb[40].mxu0 }
 0x147   :  { %v2043_v9 = vpop.f32.mrb[40].mxu1  ;;  %v1992_v10 = vpop.f32.mrb[41].mxu0 }
 0x148   :  { %v2627_v11 = vadd.f32 %v2043_v9, %v1021_v53  ;;  %v1993_v12 = vadd.f32 %v1992_v10, %v1991_v8  ;;  %v1109_v13 = vpop.f32.mrb[41].mxu1  ;;  %v1994_v14 = vpop.f32.mrb[42].mxu0 }
 0x149   :  { %v2629_v15 = vadd.f32 %v1109_v13, %v1013_v46  ;;  %v2044_v16 = vpop.f32.mrb[42].mxu1  ;;  %v1995_v3 = vpop.f32.mrb[43].mxu0 }
 0x14a   :  { %v2631_v18 = vadd.f32 %v2044_v16, %v1024_v55  ;;  %v1996_v20 = vadd.f32 %v1995_v3, %v1994_v14  ;;  %v1112_v21 = vpop.f32.mrb[43].mxu1  ;;  %v1179_v5 = vsel %vm1172_vm1, %v2627_v11, 0.0  ;;  %v1029_v22 = vadd.f32 %v1993_v12, %v2599_v17 }
 0x14b   :  { %v2636_v23 = vadd.f32 %v1112_v21, %v1016_v50  ;;  %1180 = vadd.xlane.f32.xlu1 %v1179_v5  ;;  %v1173_v24 = vsel %vm1172_vm1, %v2629_v15, 0.0  ;;  %v1239_v25 = vmul.f32 %v2627_v11, %v2627_v11  ;;  %v1237_v48 = vmul.f32 %v2629_v15, %v2629_v15 }
 0x14c   :  { %1174 = vadd.xlane.f32.xlu0 %v1173_v24  ;;  %v1032_v26 = vadd.f32 %v1996_v20, %v2601_v19  ;;  %v1182_v28 = vsel %vm1172_vm1, %v2631_v18, 0.0  ;;  %v1240_v29 = vmul.f32 %v2631_v18, %v2631_v18 }
 0x14d   :  { %v1259_v32 = vsel %vm1172_vm1, %v1239_v25, 0.0  ;;  %v1238_v43 = vmul.f32 %v2636_v23, %v2636_v23  ;;  %v1176_v46 = vsel %vm1172_vm1, %v2636_v23, 0.0  ;;  %v1253_v58 = vsel %vm1172_vm1, %v1237_v48, 0.0 }
 0x14e   :  { %v1997_v27 = vpop.f32.mrb[44].mxu0  ;;  %v1262_v42 = vsel %vm1172_vm1, %v1240_v29, 0.0  ;;  %v2242_v48 = vmov 0  }
 0x14f   :  { %v2047_v17 = vpop.f32.mrb[44].mxu1  ;;  %1183 = vadd.xlane.f32.xlu1 %v1182_v28  ;;  %v1998_v30 = vpop.f32.mrb[45].mxu0  ;;  %v1256_v56 = vsel %vm1172_vm1, %v1238_v43, 0.0  ;;  %2077 = vset.pattern.permute.xlu0 %v2242_v48 }
 0x150   :  { %v1999_v34 = vadd.f32 %v1998_v30, %v1997_v27  ;;  %v1125_v35 = vpop.f32.mrb[45].mxu1  ;;  %1260 = vadd.xlane.f32.xlu0 %v1259_v32  ;;  %v2000_v36 = vpop.f32.mrb[46].mxu0  ;;  %2076 = vset.pattern.permute.xlu1 %v2242_v48 }
 0x151   :  { %v2648_v37 = vadd.f32 %v1125_v35, %v1029_v22  ;;  %v2048_v38 = vpop.f32.mrb[46].mxu1  ;;  %v2001_v19 = vpop.f32.mrb[47].mxu0 }
 0x152   :  { %v1037_v39 = vadd.f32 %v1999_v34, %v2603_v31  ;;  %v2002_v40 = vadd.f32 %v2001_v19, %v2000_v36  ;;  %v1128_v41 = vpop.f32.mrb[47].mxu1 }
 0x153   :  { %v2654_v44 = vadd.f32 %v1128_v41, %v1032_v26  ;;  %1263 = vadd.xlane.f32.xlu1 %v1262_v42  ;;  %v1185_v9 = vsel %vm1172_vm1, %v2648_v37, 0.0  ;;  %v1241_v10 = vmul.f32 %v2648_v37, %v2648_v37 }
 0x154   :  { %v2660_v50 = vadd.f32 %v2047_v17, %v1037_v39  ;;  %v1040_v31 = vadd.f32 %v2002_v40, %v2605_v33  ;;  %1177 = vadd.xlane.f32.xlu0 %v1176_v46 }
 0x155   :  { %v1188_v33 = vsel %vm1172_vm1, %v2654_v44, 0.0  ;;  %v1242_v8 = vmul.f32 %v2654_v44, %v2654_v44  ;;  %v1265_v21 = vsel %vm1172_vm1, %v1241_v10, 0.0 }
 0x156   :  { %v2663_v52 = vadd.f32 %v2048_v38, %v1040_v31  ;;  %v2003_v54 = vpop.f32.mrb[48].mxu0  ;;  %v1243_v35 = vmul.f32 %v2660_v50, %v2660_v50 }
 0x157   :  { %1257 = vadd.xlane.f32.xlu1 %v1256_v56  ;;  %v2004_v57 = vpop.f32.mrb[49].mxu0  ;;  %v2051_v59 = vpop.f32.mrb[48].mxu1 }
 0x158   :  { %v2005_v60 = vadd.f32 %v2004_v57, %v2003_v54  ;;  %1254 = vadd.xlane.f32.xlu0 %v1253_v58  ;;  %v2006_v62 = vpop.f32.mrb[50].mxu0  ;;  %v1141_v0 = vpop.f32.mrb[49].mxu1  ;;  %v1194_v28 = vsel %vm1172_vm1, %v2663_v52, 0.0  ;;  %v1244_v32 = vmul.f32 %v2663_v52, %v2663_v52 }
 0x159   :  { %v2007_v1 = vpop.f32.mrb[51].mxu0  ;;  %v2052_v2 = vpop.f32.mrb[50].mxu1 }
 0x15a   :  { %v2008_v53 = vadd.f32 %v2007_v1, %v2006_v62  ;;  %v1045_v4 = vadd.f32 %v2005_v60, %v2607_v45  ;;  %v1144_v55 = vpop.f32.mrb[51].mxu1  ;;  %v1268_v45 = vsel %vm1172_vm1, %v1242_v8, 0.0  ;;  %v1274_v38 = vsel %vm1172_vm1, %v1244_v32, 0.0 }
 0x15b   :  { %1189 = vadd.xlane.f32.xlu1 %v1188_v33 }
 0x15c   :  { %v2676_v12 = vadd.f32 %v1141_v0, %v1045_v4  ;;  %1186 = vadd.xlane.f32.xlu0 %v1185_v9  ;;  %v1048_v13 = vadd.f32 %v2008_v53, %v2609_v47 }
 0x15e   :  { %v2679_v14 = vadd.f32 %v1144_v55, %v1048_v13  ;;  %v2009_v16 = vpop.f32.mrb[52].mxu0  ;;  %v1197_v40 = vsel %vm1172_vm1, %v2676_v12, 0.0 }
 0x15f   :  { %v2055_v3 = vpop.f32.mrb[52].mxu1  ;;  %1269 = vadd.xlane.f32.xlu1 %v1268_v45  ;;  %v2010_v20 = vpop.f32.mrb[53].mxu0 }
 0x160   :  { %v2684_v5 = vadd.f32 %v2055_v3, %v2622_v6  ;;  %v2011_v22 = vadd.f32 %v2010_v20, %v2009_v16  ;;  %v1157_v24 = vpop.f32.mrb[53].mxu1  ;;  %1266 = vadd.xlane.f32.xlu0 %v1265_v21  ;;  %v2012_v25 = vpop.f32.mrb[54].mxu0  ;;  %v1200_v19 = vsel %vm1172_vm1, %v2679_v14, 0.0  ;;  %v1246_v39 = vmul.f32 %v2679_v14, %v2679_v14 }
 0x161   :  { %v2687_v26 = vadd.f32 %v1157_v24, %v2616_v49  ;;  %v2056_v47 = vpop.f32.mrb[54].mxu1  ;;  %v2013_v27 = vpop.f32.mrb[55].mxu0  ;;  %v1191_v49 = vsel %vm1172_vm1, %v2660_v50, 0.0 }
 0x162   :  { %v1053_v29 = vadd.f32 %v2011_v22, %v2611_v61  ;;  %v2693_v17 = vadd.f32 %v2056_v47, %v2625_v7  ;;  %v2014_v30 = vadd.f32 %v2013_v27, %v2012_v25  ;;  %v1160_v6 = vpop.f32.mrb[55].mxu1  ;;  %v1280_v41 = vsel %vm1172_vm1, %v1246_v39, 0.0 }
 0x163   :  { %v2698_v34 = vadd.f32 %v1160_v6, %v2619_v51  ;;  %1195 = vadd.xlane.f32.xlu1 %v1194_v28  ;;  %v1271_v51 = vsel %vm1172_vm1, %v1243_v35, 0.0  ;;  %v1215_v46 = vsel %vm1172_vm1, %v2684_v5, 0.0  ;;  %v1209_v56 = vsel %vm1172_vm1, %v2687_v26, 0.0 }
 0x164   :  { %v2704_v36 = vadd.f32 %v2051_v59, %v1053_v29  ;;  %v1056_v61 = vadd.f32 %v2014_v30, %v2613_v63  ;;  %1192 = vadd.xlane.f32.xlu0 %v1191_v49  ;;  %v1245_v63 = vmul.f32 %v2676_v12, %v2676_v12  ;;  %v1218_v43 = vsel %vm1172_vm1, %v2693_v17, 0.0 }
 0x165   :  { %v1212_v31 = vsel %vm1172_vm1, %v2698_v34, 0.0  ;;  %v1250_v54 = vmul.f32 %v2698_v34, %v2698_v34  ;;  %v1249_v57 = vmul.f32 %v2687_v26, %v2687_v26  ;;  %v1252_v53 = vmul.f32 %v2693_v17, %v2693_v17 }
 0x166   :  { %v2707_v7 = vadd.f32 %v2052_v2, %v1056_v61  ;;  %v1277_v42 = vsel %vm1172_vm1, %v1245_v63, 0.0  ;;  %v1203_v0 = vsel %vm1172_vm1, %v2704_v36, 0.0  ;;  %v1247_v1 = vmul.f32 %v2704_v36, %v2704_v36 }
 0x167   :  { %1275 = vadd.xlane.f32.xlu1 %v1274_v38  ;;  %v1292_v58 = vsel %vm1172_vm1, %v1250_v54, 0.0  ;;  %v1289_v59 = vsel %vm1172_vm1, %v1249_v57, 0.0  ;;  %v1251_v4 = vmul.f32 %v2684_v5, %v2684_v5  ;;  %v1298_v55 = vsel %vm1172_vm1, %v1252_v53, 0.0  ;;  %v2770_v54 = vld [vmem:[%s3050_s2 + $0x10] sm:$0xff] }
 0x168   :  { %1272 = vadd.xlane.f32.xlu0 %v1271_v51  ;;  %v1206_v60 = vsel %vm1172_vm1, %v2707_v7, 0.0  ;;  %v1248_v62 = vmul.f32 %v2707_v7, %v2707_v7  ;;  %v1283_v33 = vsel %vm1172_vm1, %v1247_v1, 0.0 }
 0x169   :  { %v1295_v8 = vsel %vm1172_vm1, %v1251_v4, 0.0 }
 0x16a   :  { %v1286_v2 = vsel %vm1172_vm1, %v1248_v62, 0.0 }
 0x16b   :  { %1201 = vadd.xlane.f32.xlu1 %v1200_v19 }
 0x16c   :  { %1198 = vadd.xlane.f32.xlu0 %v1197_v40 }
 0x16f   :  { %1281 = vadd.xlane.f32.xlu1 %v1280_v41 }
 0x170   :  { %1278 = vadd.xlane.f32.xlu0 %v1277_v42 }
 0x173   :  { %1219 = vadd.xlane.f32.xlu1 %v1218_v43 }
 0x174   :  { %1216 = vadd.xlane.f32.xlu0 %v1215_v46 }
 0x177   :  { %1213 = vadd.xlane.f32.xlu1 %v1212_v31 }
 0x178   :  { %1210 = vadd.xlane.f32.xlu0 %v1209_v56 }
 0x17b   :  { %1293 = vadd.xlane.f32.xlu1 %v1292_v58 }
 0x17c   :  { %1290 = vadd.xlane.f32.xlu0 %v1289_v59 }
 0x17f   :  { %1207 = vadd.xlane.f32.xlu1 %v1206_v60 }
 0x180   :  { %1204 = vadd.xlane.f32.xlu0 %v1203_v0 }
 0x183   :  { %1287 = vadd.xlane.f32.xlu1 %v1286_v2 }
 0x184   :  { %1284 = vadd.xlane.f32.xlu0 %v1283_v33 }
 0x187   :  { %1299 = vadd.xlane.f32.xlu1 %v1298_v55 }
 0x188   :  { %1296 = vadd.xlane.f32.xlu0 %v1295_v8 }
 0x1d8   :  { %v1181_v9 = vpop.xlane.xlu1 %1180 }
 0x1d9   :  { %v1175_v10 = vpop.xlane.xlu0 %1174  ;;  %v1223_v13 = vmul.f32 0.020408163, %v1181_v9 }
 0x1da   :  { %v2755_v28 = vmul.f32 0.020408163, %v1175_v10 }
 0x1db   :  { %v1319_v20 = vmul.f32 %v1223_v13, %v1223_v13 }
 0x1dc   :  { %v1184_v16 = vpop.xlane.xlu1 %1183  ;;  %v1317_v38 = vmul.f32 %v2755_v28, %v2755_v28 }
 0x1dd   :  { %v2751_v45 = vmul.f32 0.020408163, %v1184_v16  ;;  %v1261_v3 = vpop.xlane.xlu0 %1260  ;;  %v2784_v16 = vld [vmem:[%s3050_s2 + $0x8] sm:$0xff] }
 0x1de   :  { %v1303_v21 = vmul.f32 0.020408163, %v1261_v3 }
 0x1df   :  { %v1320_v25 = vmul.f32 %v2751_v45, %v2751_v45 }
 0x1e0   :  { %v1335_v22 = vsub.f32 %v1303_v21, %v1319_v20  ;;  %v1264_v24 = vpop.xlane.xlu1 %1263  ;;  %v2789_v21 = vld [vmem:[%s3050_s2] sm:$0xff] }
 0x1e1   :  { %v1304_v47 = vmul.f32 0.020408163, %v1264_v24  ;;  %v1178_v27 = vpop.xlane.xlu0 %1177 }
 0x1e2   :  { %v1351_v29 = vadd.f32 1e-05, %v1335_v22  ;;  %v2757_v30 = vmul.f32 0.020408163, %v1178_v27  ;;  %v2794_v22 = vld [vmem:[%s3050_s2 + $0x18] sm:$0xff] }
 0x1e3   :  { %v1336_v6 = vsub.f32 %v1304_v47, %v1320_v25 }
 0x1e4   :  { %2210 = vrsqrt.f32 %v1351_v29  ;;  %v1318_v32 = vmul.f32 %v2757_v30, %v2757_v30  ;;  %v1258_v49 = vpop.xlane.xlu1 %1257 }
 0x1e5   :  { %v1302_v35 = vmul.f32 0.020408163, %v1258_v49  ;;  %v1255_v61 = vpop.xlane.xlu0 %1254  ;;  %v1352_v51 = vadd.f32 1e-05, %v1336_v6 }
 0x1e6   :  { %v1301_v19 = vmul.f32 0.020408163, %v1255_v61 }
 0x1e7   :  { %v1334_v39 = vsub.f32 %v1302_v35, %v1318_v32  ;;  %2212 = vrsqrt.f32 %v1352_v51 }
 0x1e8   :  { %v1333_v40 = vsub.f32 %v1301_v19, %v1317_v38  ;;  %v1190_v63 = vpop.xlane.xlu1 %1189 }
 0x1e9   :  { %v1350_v41 = vadd.f32 1e-05, %v1334_v39  ;;  %v2763_v42 = vmul.f32 0.020408163, %v1190_v63  ;;  %v1187_v43 = vpop.xlane.xlu0 %1186 }
 0x1ea   :  { %v1349_v46 = vadd.f32 1e-05, %v1333_v40  ;;  %v2765_v48 = vmul.f32 0.020408163, %v1187_v43 }
 0x1eb   :  { %2214 = vrsqrt.f32 %v1350_v41  ;;  %v1322_v56 = vmul.f32 %v2763_v42, %v2763_v42 }
 0x1ec   :  { %2216 = vrsqrt.f32 %v1349_v46  ;;  %v1270_v31 = vpop.xlane.xlu1 %1269  ;;  %v1321_v60 = vmul.f32 %v2765_v48, %v2765_v48 }
 0x1ed   :  { %v1306_v57 = vmul.f32 0.020408163, %v1270_v31  ;;  %v1267_v58 = vpop.xlane.xlu0 %1266 }
 0x1ee   :  { %v2211_v59 = vpop.eup %2210  ;;  %v1305_v62 = vmul.f32 0.020408163, %v1267_v58 }
 0x1ef   :  { %v1338_v0 = vsub.f32 %v1306_v57, %v1322_v56  ;;  %v1399_v1 = vmul.f32 %v2211_v59, %v2770_v54  ;;  %v2816_v56 = vld [vmem:[%s3050_s2 + $0x20] sm:$0xff]  ;;  %v2821_v57 = vld [vmem:[%s3050_s2 + $0x28] sm:$0xff] }
 0x1f0   :  { %v1337_v2 = vsub.f32 %v1305_v62, %v1321_v60  ;;  %v1196_v53 = vpop.xlane.xlu1 %1195 }
 0x1f1   :  { %v1354_v33 = vadd.f32 1e-05, %v1338_v0  ;;  %v2777_v4 = vmul.f32 0.020408163, %v1196_v53  ;;  %1521 = vperm.xlu1 %2076, %v1399_v1   ;;  %v1193_v55 = vpop.xlane.xlu0 %1192  ;;  %v1415_v10 = vmul.f32 %v1399_v1, %v1223_v13  ;;  %v2213_v3 = vpop.eup %2212 }
 0x1f2   :  { %v1353_v8 = vadd.f32 1e-05, %v1337_v2  ;;  %v2779_v9 = vmul.f32 0.020408163, %v1193_v55  ;;  %v2804_v61 = vmul.f32 %v2213_v3, %v2794_v22 }
 0x1f3   :  { %2218 = vrsqrt.f32 %v1354_v33  ;;  %v1324_v13 = vmul.f32 %v2777_v4, %v2777_v4 }
 0x1f4   :  { %2220 = vrsqrt.f32 %v1353_v8  ;;  %v1276_v20 = vpop.xlane.xlu1 %1275  ;;  %v1323_v29 = vmul.f32 %v2779_v9, %v2779_v9  ;;  %v1416_v43 = vmul.f32 %v2804_v61, %v2751_v45 }
 0x1f5   :  { %v2215_v24 = vpop.eup %2214  ;;  %v1308_v25 = vmul.f32 0.020408163, %v1276_v20  ;;  %1449 = vrot.lane.b32.xlu1 %v1415_v10, %s2243_s13  ;;  %v1273_v47 = vpop.xlane.xlu0 %1272 }
 0x1f6   :  { %v2217_v27 = vpop.eup %2216  ;;  %v1307_v6 = vmul.f32 0.020408163, %v1273_v47  ;;  %v1398_v32 = vmul.f32 %v2215_v24, %v2784_v16  ;;  %v2850_v47 = vld [vmem:[%s3050_s2 + $0x30] sm:$0xff] }
 0x1f7   :  { %v1340_v49 = vsub.f32 %v1308_v25, %v1324_v13  ;;  %v1397_v35 = vmul.f32 %v2217_v27, %v2789_v21  ;;  %v2845_v13 = vld [vmem:[%s3050_s2 + $0x38] sm:$0xff] }
 0x1f8   :  { %v1339_v38 = vsub.f32 %v1307_v6, %v1323_v29  ;;  %v1202_v51 = vpop.xlane.xlu1 %1201  ;;  %v1414_v2 = vmul.f32 %v1398_v32, %v2757_v30 }
 0x1f9   :  { %v1356_v19 = vadd.f32 1e-05, %v1340_v49  ;;  %v2806_v39 = vmul.f32 0.020408163, %v1202_v51  ;;  %1516 = vperm.xlu1 %2076, %v1398_v32   ;;  %1511 = vperm.xlu0 %2077, %v1397_v35   ;;  %v1199_v40 = vpop.xlane.xlu0 %1198  ;;  %v1413_v46 = vmul.f32 %v1397_v35, %v2755_v28 }
 0x1fa   :  { %v1355_v63 = vadd.f32 1e-05, %v1339_v38  ;;  %v2808_v41 = vmul.f32 0.020408163, %v1199_v40 }
 0x1fb   :  { %2222 = vrsqrt.f32 %v1356_v19  ;;  %v1326_v59 = vmul.f32 %v2806_v39, %v2806_v39  ;;  %v2870_v19 = vld [vmem:[%s3050_s2 + $0x48] sm:$0xff] }
 0x1fc   :  { %2224 = vrsqrt.f32 %v1355_v63  ;;  %v1282_v31 = vpop.xlane.xlu1 %1281  ;;  %v1325_v62 = vmul.f32 %v2808_v41, %v2808_v41 }
 0x1fd   :  { %v2219_v58 = vpop.eup %2218  ;;  %v1310_v60 = vmul.f32 0.020408163, %v1282_v31  ;;  %1451 = vrot.lane.b32.xlu1 %v1416_v43, %s2243_s13  ;;  %1445 = vrot.lane.b32.xlu0 %v1413_v46, %s2243_s13  ;;  %v1279_v45 = vpop.xlane.xlu0 %1278 }
 0x1fe   :  { %v2221_v28 = vpop.eup %2220  ;;  %v1309_v0 = vmul.f32 0.020408163, %v1279_v45  ;;  %v2834_v33 = vmul.f32 %v2219_v58, %v2821_v57 }
 0x1ff   :  { %v1342_v1 = vsub.f32 %v1310_v60, %v1326_v59  ;;  %v2831_v53 = vmul.f32 %v2221_v28, %v2816_v56 }
 0x200   :  { %v1341_v55 = vsub.f32 %v1309_v0, %v1325_v62  ;;  %v1220_v8 = vpop.xlane.xlu1 %1219  ;;  %v1418_v30 = vmul.f32 %v2834_v33, %v2763_v42 }
 0x201   :  { %v1358_v10 = vadd.f32 1e-05, %v1342_v1  ;;  %1447 = vrot.lane.b32.xlu1 %v1414_v2, %s2243_s13  ;;  %v1217_v3 = vpop.xlane.xlu0 %1216  ;;  %v1417_v20 = vmul.f32 %v2831_v53, %v2765_v48  ;;  %v1236_v1 = vmul.f32 0.020408163, %v1220_v8 }
 0x202   :  { %v1357_v24 = vadd.f32 1e-05, %v1341_v55 }
 0x203   :  { %2226 = vrsqrt.f32 %v1358_v10  ;;  %1453 = vrot.lane.b32.xlu0 %v1417_v20, %s2243_s13 }
 0x204   :  { %2228 = vrsqrt.f32 %v1357_v24  ;;  %v1214_v25 = vpop.xlane.xlu1 %1213  ;;  %v1235_v24 = vmul.f32 0.020408163, %v1217_v3 }
 0x205   :  { %v2223_v48 = vpop.eup %2222  ;;  %1455 = vrot.lane.b32.xlu1 %v1418_v30, %s2243_s13  ;;  %v1211_v27 = vpop.xlane.xlu0 %1210  ;;  %v2864_v51 = vmul.f32 0.020408163, %v1214_v25 }
 0x206   :  { %v2225_v29 = vpop.eup %2224  ;;  %v2854_v6 = vmul.f32 %v2223_v48, %v2845_v13  ;;  %v2872_v40 = vmul.f32 0.020408163, %v1211_v27 }
 0x207   :  { %v2857_v42 = vmul.f32 %v2225_v29, %v2850_v47  ;;  %v1330_v60 = vmul.f32 %v2864_v51, %v2864_v51 }
 0x208   :  { %v1294_v32 = vpop.xlane.xlu1 %1293  ;;  %v1420_v49 = vmul.f32 %v2854_v6, %v2777_v4  ;;  %v2877_v4 = vld [vmem:[%s3050_s2 + $0x40] sm:$0xff]  ;;  %v1329_v28 = vmul.f32 %v2872_v40, %v2872_v40 }
 0x209   :  { %v1291_v35 = vpop.xlane.xlu0 %1290  ;;  %v1419_v38 = vmul.f32 %v2857_v42, %v2779_v9  ;;  %v1314_v43 = vmul.f32 0.020408163, %v1294_v32  ;;  %v1332_v32 = vmul.f32 %v1236_v1, %v1236_v1 }
 0x20a   :  { %1459 = vrot.lane.b32.xlu1 %v1420_v49, %s2243_s13  ;;  %v1313_v58 = vmul.f32 0.020408163, %v1291_v35 }
 0x20b   :  { %1457 = vrot.lane.b32.xlu0 %v1419_v38, %s2243_s13  ;;  %v1346_v2 = vsub.f32 %v1314_v43, %v1330_v60  ;;  %v1331_v38 = vmul.f32 %v1235_v24, %v1235_v24 }
 0x20c   :  { %v1208_v63 = vpop.xlane.xlu1 %1207  ;;  %v1345_v30 = vsub.f32 %v1313_v58, %v1329_v28 }
 0x20d   :  { %v2227_v9 = vpop.eup %2226  ;;  %v1205_v46 = vpop.xlane.xlu0 %1204  ;;  %v1232_v55 = vmul.f32 0.020408163, %v1208_v63  ;;  %v1362_v49 = vadd.f32 1e-05, %v1346_v2  ;;  %v2898_v2 = vld [vmem:[%s3050_s2 + $0x78] sm:$0xff] }
 0x20e   :  { %v2229_v31 = vpop.eup %2228  ;;  %v2880_v59 = vmul.f32 %v2227_v9, %v2870_v19  ;;  %v1231_v25 = vmul.f32 0.020408163, %v1205_v46  ;;  %v1361_v63 = vadd.f32 1e-05, %v1345_v30 }
 0x20f   :  { %v2885_v45 = vmul.f32 %v2229_v31, %v2877_v4  ;;  %2230 = vrsqrt.f32 %v1362_v49 }
 0x210   :  { %v1288_v62 = vpop.xlane.xlu1 %1287  ;;  %v1422_v0 = vmul.f32 %v2880_v59, %v2806_v39  ;;  %v1328_v39 = vmul.f32 %v1232_v55, %v1232_v55  ;;  %v1327_v9 = vmul.f32 %v1231_v25, %v1231_v25  ;;  %2232 = vrsqrt.f32 %v1361_v63 }
 0x211   :  { %v1285_v10 = vpop.xlane.xlu0 %1284  ;;  %v1421_v20 = vmul.f32 %v2885_v45, %v2808_v41  ;;  %v1312_v48 = vmul.f32 0.020408163, %v1288_v62 }
 0x212   :  { %1463 = vrot.lane.b32.xlu1 %v1422_v0, %s2243_s13  ;;  %v1311_v27 = vmul.f32 0.020408163, %v1285_v10 }
 0x213   :  { %1461 = vrot.lane.b32.xlu0 %v1421_v20, %s2243_s13  ;;  %v1344_v41 = vsub.f32 %v1312_v48, %v1328_v39  ;;  %v2903_v20 = vld [vmem:[%s3050_s2 + $0x70] sm:$0xff]  ;;  %v2908_v48 = vld [vmem:[%s3050_s2 + $0x68] sm:$0xff] }
 0x214   :  { %v1300_v29 = vpop.xlane.xlu1 %1299  ;;  %v1343_v31 = vsub.f32 %v1311_v27, %v1327_v9  ;;  %v2922_v9 = vld [vmem:[%s3050_s2 + $0x58] sm:$0xff] }
 0x215   :  { %v1316_v8 = vmul.f32 0.020408163, %v1300_v29  ;;  %v1297_v35 = vpop.xlane.xlu0 %1296  ;;  %v1360_v28 = vadd.f32 1e-05, %v1344_v41  ;;  %v2928_v41 = vld [vmem:[%s3050_s2 + $0x50] sm:$0xff] }
 0x216   :  { %v1315_v43 = vmul.f32 0.020408163, %v1297_v35  ;;  %v1359_v62 = vadd.f32 1e-05, %v1343_v31 }
 0x217   :  { %v1348_v3 = vsub.f32 %v1316_v8, %v1332_v32  ;;  %v2914_v32 = vld [vmem:[%s3050_s2 + $0x60] sm:$0xff] }
 0x218   :  { %v1347_v46 = vsub.f32 %v1315_v43, %v1331_v38 }
 0x219   :  { %v1364_v58 = vadd.f32 1e-05, %v1348_v3  ;;  %v2231_v0 = vpop.eup %2230 }
 0x21a   :  { %v1363_v60 = vadd.f32 1e-05, %v1347_v46  ;;  %v2233_v10 = vpop.eup %2232  ;;  %v1410_v8 = vmul.f32 %v2231_v0, %v2908_v48 }
 0x21b   :  { %2234 = vrsqrt.f32 %v1364_v58  ;;  %v1409_v63 = vmul.f32 %v2233_v10, %v2914_v32 }
 0x21c   :  { %2236 = vrsqrt.f32 %v1363_v60 }
 0x21d   :  { %2238 = vrsqrt.f32 %v1360_v28  ;;  %v1425_v3 = vmul.f32 %v1409_v63, %v2872_v40 }
 0x21e   :  { %2240 = vrsqrt.f32 %v1359_v62 }
 0x225   :  { %v2235_v30 = vpop.eup %2234 }
 0x226   :  { %v2237_v27 = vpop.eup %2236  ;;  %v1412_v29 = vmul.f32 %v2235_v30, %v2898_v2 }
 0x227   :  { %v1411_v49 = vmul.f32 %v2237_v27, %v2903_v20  ;;  %v2239_v35 = vpop.eup %2238 }
 0x228   :  { %v1428_v39 = vmul.f32 %v1412_v29, %v1236_v1  ;;  %v2241_v43 = vpop.eup %2240  ;;  %v1426_v1 = vmul.f32 %v1410_v8, %v2864_v51  ;;  %v2244_v51 = vmov 1  }
 0x229   :  { %v1427_v38 = vmul.f32 %v1411_v49, %v1235_v24  ;;  %v1408_v24 = vmul.f32 %v2239_v35, %v2922_v9  ;;  %v1407_v31 = vmul.f32 %v2241_v43, %v2928_v41 }
 0x22a   :  { %1475 = vrot.lane.b32.xlu1 %v1428_v39, %s2243_s13 }
 0x22b   :  { %1473 = vrot.lane.b32.xlu0 %v1427_v38, %s2243_s13  ;;  %v1424_v46 = vmul.f32 %v1408_v24, %v1232_v55  ;;  %v1423_v58 = vmul.f32 %v1407_v31, %v1231_v25 }
 0x22e   :  { %1471 = vrot.lane.b32.xlu1 %v1426_v1, %s2243_s13 }
 0x22f   :  { %1469 = vrot.lane.b32.xlu0 %v1425_v3, %s2243_s13 }
 0x232   :  { %1467 = vrot.lane.b32.xlu1 %v1424_v46, %s2243_s13 }
 0x233   :  { %1465 = vrot.lane.b32.xlu0 %v1423_v58, %s2243_s13 }
 0x236   :  { %1531 = vperm.xlu1 %2076, %v2831_v53  }
 0x237   :  { %1526 = vperm.xlu0 %2077, %v2804_v61  }
 0x23a   :  { %1541 = vperm.xlu1 %2076, %v2857_v42  }
 0x23b   :  { %1536 = vperm.xlu0 %2077, %v2834_v33  }
 0x23e   :  { %1551 = vperm.xlu1 %2076, %v2885_v45  }
 0x23f   :  { %1546 = vperm.xlu0 %2077, %v2854_v6  }
 0x242   :  { %1561 = vperm.xlu1 %2076, %v1407_v31  }
 0x243   :  { %1556 = vperm.xlu0 %2077, %v2880_v59  }
 0x246   :  { %1571 = vperm.xlu1 %2076, %v1409_v63  }
 0x247   :  { %1566 = vperm.xlu0 %2077, %v1408_v24  }
 0x24a   :  { %1581 = vperm.xlu1 %2076, %v1411_v49  }
 0x24b   :  { %1576 = vperm.xlu0 %2077, %v1410_v8  }
 0x24e   :  { %2078 = vset.pattern.permute.xlu1 %v2244_v51 }
 0x24f   :  { %1586 = vperm.xlu0 %2077, %v1412_v29  }
 0x253   :  { %2079 = vset.pattern.permute.xlu0 %v2244_v51 }
 0x270   :  { %v1522_v61 = vpop.permute.xlu1 %1521 }
 0x274   :  { %v1450_v53 = vpop.permute.xlu1 %1449 }
 0x275   :  { %v1495_v42 = vsub.f32 %v2770_v54, %v1450_v53 }
 0x277   :  { %1617 = vperm.xlu1 %2078, %v1495_v42  }
 0x278   :  { %v2947_v33 = vpop.permute.xlu1 %1516  ;;  %v2949_v40 = vpop.permute.xlu0 %1511 }
 0x27c   :  { %v1452_v6 = vpop.permute.xlu1 %1451  ;;  %v1446_v45 = vpop.permute.xlu0 %1445 }
 0x27d   :  { %v1493_v59 = vsub.f32 %v2789_v21, %v1446_v45  ;;  %v1496_v60 = vsub.f32 %v2794_v22, %v1452_v6 }
 0x27f   :  { %1607 = vperm.xlu1 %2078, %v1493_v59  }
 0x280   :  { %v1448_v55 = vpop.permute.xlu1 %1447  ;;  %v1454_v25 = vpop.permute.xlu0 %1453 }
 0x281   :  { %v1494_v28 = vsub.f32 %v2784_v16, %v1448_v55  ;;  %v1497_v0 = vsub.f32 %v2816_v56, %v1454_v25  ;;  %v1590_v25 = vmul.f32 %v2947_v33, %v2636_v23 }
 0x283   :  { %1612 = vperm.xlu0 %2079, %v1494_v28   ;;  %1622 = vperm.xlu1 %2078, %v1496_v60  }
 0x284   :  { %v1456_v62 = vpop.permute.xlu1 %1455  ;;  %v1458_v54 = vpop.permute.xlu0 %1457 }
 0x285   :  { %v1498_v10 = vsub.f32 %v2821_v57, %v1456_v62  ;;  %v1499_v21 = vsub.f32 %v2850_v47, %v1458_v54 }
 0x287   :  { %1632 = vperm.xlu1 %2078, %v1498_v10   ;;  %1627 = vperm.xlu0 %2079, %v1497_v0  }
 0x288   :  { %v1460_v30 = vpop.permute.xlu1 %1459  ;;  %v1462_v29 = vpop.permute.xlu0 %1461 }
 0x289   :  { %v1500_v27 = vsub.f32 %v2845_v13, %v1460_v30  ;;  %v1501_v16 = vsub.f32 %v2877_v4, %v1462_v29 }
 0x28b   :  { %1642 = vperm.xlu1 %2078, %v1500_v27   ;;  %1637 = vperm.xlu0 %2079, %v1499_v21  }
 0x28c   :  { %v1464_v22 = vpop.permute.xlu1 %1463 }
 0x28d   :  { %v1502_v49 = vsub.f32 %v2870_v19, %v1464_v22 }
 0x28f   :  { %1652 = vperm.xlu1 %2078, %v1502_v49   ;;  %1647 = vperm.xlu0 %2079, %v1501_v16  }
 0x29c   :  { %v1476_v56 = vpop.permute.xlu1 %1475 }
 0x29d   :  { %v1474_v39 = vpop.permute.xlu0 %1473  ;;  %v1508_v19 = vsub.f32 %v2898_v2, %v1476_v56 }
 0x29e   :  { %v1507_v43 = vsub.f32 %v2903_v20, %v1474_v39  ;;  %v1589_v20 = vmul.f32 %v2949_v40, %v2629_v15 }
 0x2a0   :  { %v1472_v57 = vpop.permute.xlu1 %1471 }
 0x2a1   :  { %v1506_v8 = vsub.f32 %v2908_v48, %v1472_v57  ;;  %v1470_v35 = vpop.permute.xlu0 %1469 }
 0x2a2   :  { %v1505_v47 = vsub.f32 %v2914_v32, %v1470_v35 }
 0x2a3   :  { %1672 = vperm.xlu1 %2078, %v1506_v8  }
 0x2a4   :  { %v1468_v13 = vpop.permute.xlu1 %1467  ;;  %1667 = vperm.xlu0 %2079, %v1505_v47  }
 0x2a5   :  { %v1504_v38 = vsub.f32 %v2922_v9, %v1468_v13  ;;  %v1466_v63 = vpop.permute.xlu0 %1465 }
 0x2a6   :  { %v1503_v4 = vsub.f32 %v2928_v41, %v1466_v63  ;;  %v1591_v41 = vmul.f32 %v1522_v61, %v2627_v11 }
 0x2a7   :  { %1662 = vperm.xlu1 %2078, %v1504_v38  }
 0x2a8   :  { %1657 = vperm.xlu0 %2079, %v1503_v4  }
 0x2ab   :  { %1682 = vperm.xlu1 %2078, %v1508_v19  }
 0x2ac   :  { %1677 = vperm.xlu0 %2079, %v1507_v43  }
 0x2b5   :  { %v1532_v48 = vpop.permute.xlu1 %1531 }
 0x2b6   :  { %v1527_v1 = vpop.permute.xlu0 %1526  ;;  %v1593_v54 = vmul.f32 %v1532_v48, %v2648_v37 }
 0x2b7   :  { %v1592_v60 = vmul.f32 %v1527_v1, %v2631_v18 }
 0x2b9   :  { %v1542_v24 = vpop.permute.xlu1 %1541 }
 0x2ba   :  { %v1537_v32 = vpop.permute.xlu0 %1536  ;;  %v1595_v0 = vmul.f32 %v1542_v24, %v2660_v50 }
 0x2bb   :  { %v1594_v15 = vmul.f32 %v1537_v32, %v2654_v44 }
 0x2bd   :  { %v1552_v3 = vpop.permute.xlu1 %1551 }
 0x2be   :  { %v1547_v31 = vpop.permute.xlu0 %1546  ;;  %v1597_v27 = vmul.f32 %v1552_v3, %v2676_v12 }
 0x2bf   :  { %v1596_v37 = vmul.f32 %v1547_v31, %v2663_v52 }
 0x2c1   :  { %v1562_v46 = vpop.permute.xlu1 %1561 }
 0x2c2   :  { %v1557_v58 = vpop.permute.xlu0 %1556  ;;  %v1599_v35 = vmul.f32 %v1562_v46, %v2704_v36 }
 0x2c3   :  { %v1598_v50 = vmul.f32 %v1557_v58, %v2679_v14 }
 0x2c5   :  { %v1572_v9 = vpop.permute.xlu1 %1571 }
 0x2c6   :  { %v1567_v51 = vpop.permute.xlu0 %1566  ;;  %v1601_v14 = vmul.f32 %v1572_v9, %v2687_v26 }
 0x2c7   :  { %v1600_v8 = vmul.f32 %v1567_v51, %v2707_v7 }
 0x2c9   :  { %v1582_v53 = vpop.permute.xlu1 %1581 }
 0x2ca   :  { %v1577_v2 = vpop.permute.xlu0 %1576  ;;  %v1603_v7 = vmul.f32 %v1582_v53, %v2684_v5 }
 0x2cb   :  { %v1602_v12 = vmul.f32 %v1577_v2, %v2698_v34 }
 0x2ce   :  { %v1587_v45 = vpop.permute.xlu0 %1586 }
 0x2cf   :  { %v1604_v38 = vmul.f32 %v1587_v45, %v2693_v17 }
 0x2f6   :  { %v1618_v42 = vpop.permute.xlu1 %1617 }
 0x2f7   :  { %v1687_v6 = vadd.f32 %v1618_v42, %v1591_v41 }
 0x2f9   :  { %1703 = vst.msk [vmem:[%s3051_s3 + $0x10] sm:$0xff] %vm1172_vm1, %v1687_v6 }
 0x2fe   :  { %v1608_v59 = vpop.permute.xlu1 %1607 }
 0x2ff   :  { %v1685_v55 = vadd.f32 %v1608_v59, %v1589_v20 }
 0x301   :  { %1701 = vst.msk [vmem:[%s3051_s3] sm:$0xff] %vm1172_vm1, %v1685_v55 }
 0x302   :  { %v1623_v11 = vpop.permute.xlu1 %1622  ;;  %v1613_v61 = vpop.permute.xlu0 %1612 }
 0x303   :  { %v1688_v28 = vadd.f32 %v1623_v11, %v1592_v60  ;;  %v1686_v62 = vadd.f32 %v1613_v61, %v1590_v25 }
 0x305   :  { %1704 = vst.msk [vmem:[%s3051_s3 + $0x18] sm:$0xff] %vm1172_vm1, %v1688_v28  ;;  %1702 = vst.msk [vmem:[%s3051_s3 + $0x8] sm:$0xff] %vm1172_vm1, %v1686_v62 }
 0x306   :  { %v1633_v18 = vpop.permute.xlu1 %1632  ;;  %v1628_v23 = vpop.permute.xlu0 %1627 }
 0x307   :  { %v1690_v33 = vadd.f32 %v1633_v18, %v1594_v15  ;;  %v1689_v40 = vadd.f32 %v1628_v23, %v1593_v54 }
 0x309   :  { %1706 = vst.msk [vmem:[%s3051_s3 + $0x28] sm:$0xff] %vm1172_vm1, %v1690_v33  ;;  %1705 = vst.msk [vmem:[%s3051_s3 + $0x20] sm:$0xff] %vm1172_vm1, %v1689_v40 }
 0x30a   :  { %v1643_v44 = vpop.permute.xlu1 %1642  ;;  %v1638_v10 = vpop.permute.xlu0 %1637 }
 0x30b   :  { %v1692_v30 = vadd.f32 %v1643_v44, %v1596_v37  ;;  %v1691_v21 = vadd.f32 %v1638_v10, %v1595_v0 }
 0x30d   :  { %1708 = vst.msk [vmem:[%s3051_s3 + $0x38] sm:$0xff] %vm1172_vm1, %v1692_v30  ;;  %1707 = vst.msk [vmem:[%s3051_s3 + $0x30] sm:$0xff] %vm1172_vm1, %v1691_v21 }
 0x30e   :  { %v1653_v52 = vpop.permute.xlu1 %1652  ;;  %v1648_v29 = vpop.permute.xlu0 %1647 }
 0x30f   :  { %v1694_v22 = vadd.f32 %v1653_v52, %v1598_v50  ;;  %v1693_v16 = vadd.f32 %v1648_v29, %v1597_v27 }
 0x311   :  { %1710 = vst.msk [vmem:[%s3051_s3 + $0x48] sm:$0xff] %vm1172_vm1, %v1694_v22  ;;  %1709 = vst.msk [vmem:[%s3051_s3 + $0x40] sm:$0xff] %vm1172_vm1, %v1693_v16 }
 0x322   :  { %v1673_v49 = vpop.permute.xlu1 %1672 }
 0x323   :  { %v1698_v56 = vadd.f32 %v1673_v49, %v1602_v12  ;;  %v1668_v39 = vpop.permute.xlu0 %1667 }
 0x324   :  { %v1697_v57 = vadd.f32 %v1668_v39, %v1601_v14 }
 0x325   :  { %1714 = vst.msk [vmem:[%s3051_s3 + $0x68] sm:$0xff] %vm1172_vm1, %v1698_v56 }
 0x326   :  { %1713 = vst.msk [vmem:[%s3051_s3 + $0x60] sm:$0xff] %vm1172_vm1, %v1697_v57  ;;  %v1663_v34 = vpop.permute.xlu1 %1662 }
 0x327   :  { %v1696_v26 = vadd.f32 %v1663_v34, %v1600_v8  ;;  %v1658_v47 = vpop.permute.xlu0 %1657 }
 0x328   :  { %v1695_v13 = vadd.f32 %v1658_v47, %v1599_v35 }
 0x329   :  { %1712 = vst.msk [vmem:[%s3051_s3 + $0x58] sm:$0xff] %vm1172_vm1, %v1696_v26 }
 0x32a   :  { %1711 = vst.msk [vmem:[%s3051_s3 + $0x50] sm:$0xff] %vm1172_vm1, %v1695_v13  ;;  %v1683_v36 = vpop.permute.xlu1 %1682 }
 0x32b   :  { %v1700_v63 = vadd.f32 %v1683_v36, %v1604_v38  ;;  %v1678_v4 = vpop.permute.xlu0 %1677 }
 0x32c   :  { %v1699_v19 = vadd.f32 %v1678_v4, %v1603_v7 }
 0x32d   :  { %1716 = vst.msk [vmem:[%s3051_s3 + $0x78] sm:$0xff] %vm1172_vm1, %v1700_v63 }
 0x32e   :  { %1715 = vst.msk [vmem:[%s3051_s3 + $0x70] sm:$0xff] %vm1172_vm1, %v1699_v19 }

</bundles_post_ra>
